<compile_context>
chip_gen: v7x
topology: tpu7x:2x2x1
jax: 0.10.0
libtpu: 0.0.40
codegen_flags: <defaults>
</compile_context>

<pallas_src>
import jax
import jax.numpy as jnp
from jax.experimental import pallas as pl
from jax.experimental.pallas import tpu as pltpu


def _normalize_kernel(x_ref, scale_ref, bias_ref, o_ref):
    # x_ref:     (1, tc, thw)  input tile, original dtype
    # scale_ref: (1, tc, 1)    f32, 1/std per channel
    # bias_ref:  (1, tc, 1)    f32, -mean/std per channel
    # o_ref:     (1, tc, thw)  f32 output tile
    x = x_ref[...].astype(jnp.float32)  # `.float()` done in-kernel (no extra HBM pass)
    o_ref[...] = x * scale_ref[...] + bias_ref[...]


def _choose_tiles(C, HW):
    # Channel tile: multiple of 8 sublanes unless we can take the whole axis.
    tc = C if C <= 64 else 64
    # Spatial tile: large multiple of 128 lanes, capped so double-buffered
    # in+out f32 tiles stay ~2 MiB (fits v5e/v6e/v7x scoped VMEM comfortably).
    thw = HW if HW <= 2048 else 2048
    return tc, thw


def base_forward(x, mean, std, normalize=True, donate_input=False):
    """JAX/Pallas equivalent of Base.forward's normalization path.

    x:    (N, C, H, W), any float/int dtype (cast to f32 inside the kernel,
          matching `.float()`).
    mean: (C,) per-channel mean
    std:  (C,) per-channel std (zeros treated as 1.0, as in
          set_normalization_params)
    donate_input: if True and x is already float32, alias the input HBM
          buffer to the output (in-place normalize).
    """
    if not normalize:
        return x  # forward() would fall through to the abstract body

    N, C, H, W = x.shape
    HW = H * W
    tc, thw = _choose_tiles(C, HW)

    # Flattened view in the ORIGINAL dtype (contiguous reshape -> no HBM copy).
    x_flat = x.reshape(N, C, HW)

    # set_normalization_params: std[std == 0.0] = 1.0.  Fold mean/std into a
    # per-channel scale/bias so the kernel does a single mul+add per element.
    std_fixed = jnp.where(std == 0.0, 1.0, std).astype(jnp.float32)
    scale = (1.0 / std_fixed).reshape(1, C, 1)
    bias = (-mean.astype(jnp.float32) / std_fixed).reshape(1, C, 1)

    grid = (N, pl.cdiv(C, tc), pl.cdiv(HW, thw))

    extra_kwargs = {}
    if donate_input and x_flat.dtype == jnp.float32:
        # Elementwise read-1/write-1: reuse the input buffer for the output.
        extra_kwargs["input_output_aliases"] = {0: 0}

    out_flat = pl.pallas_call(
        _normalize_kernel,
        out_shape=jax.ShapeDtypeStruct((N, C, HW), jnp.float32),
        grid=grid,
        in_specs=[
            pl.BlockSpec((1, tc, thw), lambda n, c, h: (n, c, h)),
            pl.BlockSpec((1, tc, 1), lambda n, c, h: (0, c, 0)),
            pl.BlockSpec((1, tc, 1), lambda n, c, h: (0, c, 0)),
        ],
        out_specs=pl.BlockSpec((1, tc, thw), lambda n, c, h: (n, c, h)),
        compiler_params=pltpu.CompilerParams(
            dimension_semantics=("parallel", "parallel", "parallel")
        ),
        **extra_kwargs,
    )(x_flat, scale, bias)

    return out_flat.reshape(N, C, H, W)


if __name__ == "__main__":
    key = jax.random.PRNGKey(0)
    kx, km, ks = jax.random.split(key, 3)

    N, C, H, W = 2, 4, 16, 16
    x = jax.random.normal(kx, (N, C, H, W), dtype=jnp.float32)
    mean = jax.random.normal(km, (C,), dtype=jnp.float32)
    std = jnp.abs(jax.random.normal(ks, (C,), dtype=jnp.float32))
    std = std.at[1].set(0.0)  # exercise the std==0 -> 1.0 path

    # Reference in plain JAX (same semantics as the PyTorch module).
    std_fixed = jnp.where(std == 0.0, 1.0, std)
    ref = (x - mean.reshape(1, C, 1, 1)) / std_fixed.reshape(1, C, 1, 1)

    # f32 input path.
    out = base_forward(x, mean, std, normalize=True)
    jax.block_until_ready(out)
    assert out.shape == (N, C, H, W)
    assert out.dtype == jnp.float32
    assert jnp.allclose(out, ref, atol=1e-5, rtol=1e-5)

    # bf16 input path: cast happens inside the kernel (no wrapper f32 copy).
    out_bf16_in = base_forward(x.astype(jnp.bfloat16), mean, std, normalize=True)
    jax.block_until_ready(out_bf16_in)
    assert out_bf16_in.dtype == jnp.float32
    assert jnp.allclose(out_bf16_in, ref, atol=3e-2, rtol=3e-2)

    # normalize=None path is a passthrough (forward hits the abstract body).
    out_passthrough = base_forward(x, mean, std, normalize=None)
    assert out_passthrough is x

    print("KERNEL_OK")
</pallas_src>

<mosaic_0001>
module attributes {stable_mosaic.version = 11 : i64} {
  func.func @_normalize_kernel(%arg0: i32, %arg1: i32, %arg2: i32, %arg3: memref<1x4x256xf32, #tpu.memory_space<vmem>>, %arg4: memref<1x4x1xf32, #tpu.memory_space<vmem>>, %arg5: memref<1x4x1xf32, #tpu.memory_space<vmem>>, %arg6: memref<1x4x256xf32, #tpu.memory_space<vmem>>) attributes {dimension_semantics = [#tpu.dimension_semantics<parallel>, #tpu.dimension_semantics<parallel>, #tpu.dimension_semantics<parallel>], iteration_bounds = array<i64: 2, 1, 1>, scalar_prefetch = 0 : i64, scratch_operands = 0 : i64, tpu.core_type = #tpu.core_type<tc>, window_params = [{transform_indices = @transform_0, window_bounds = array<i64: 1, 4, 256>}, {transform_indices = @transform_1, window_bounds = array<i64: 1, 4, 1>}, {transform_indices = @transform_2, window_bounds = array<i64: 1, 4, 1>}, {transform_indices = @transform_3, window_bounds = array<i64: 1, 4, 256>}]} {
    %c0 = arith.constant 0 : index
    %c0_0 = arith.constant 0 : index
    %c0_1 = arith.constant 0 : index
    %0 = vector.load %arg3[%c0, %c0_0, %c0_1] : memref<1x4x256xf32, #tpu.memory_space<vmem>>, vector<1x4x256xf32>
    %c0_2 = arith.constant 0 : index
    %c0_3 = arith.constant 0 : index
    %c0_4 = arith.constant 0 : index
    %1 = vector.load %arg4[%c0_2, %c0_3, %c0_4] : memref<1x4x1xf32, #tpu.memory_space<vmem>>, vector<1x4x1xf32>
    %2 = vector.broadcast %1 : vector<1x4x1xf32> to vector<1x4x256xf32>
    %3 = arith.mulf %0, %2 : vector<1x4x256xf32>
    %c0_5 = arith.constant 0 : index
    %c0_6 = arith.constant 0 : index
    %c0_7 = arith.constant 0 : index
    %4 = vector.load %arg5[%c0_5, %c0_6, %c0_7] : memref<1x4x1xf32, #tpu.memory_space<vmem>>, vector<1x4x1xf32>
    %5 = vector.broadcast %4 : vector<1x4x1xf32> to vector<1x4x256xf32>
    %6 = arith.addf %3, %5 : vector<1x4x256xf32>
    %c0_8 = arith.constant 0 : index
    %c0_9 = arith.constant 0 : index
    %c0_10 = arith.constant 0 : index
    %7 = vector.load %arg6[%c0_8, %c0_9, %c0_10] : memref<1x4x256xf32, #tpu.memory_space<vmem>>, vector<1x4x256xf32>
    tpu.vector_store %arg6[%c0_8, %c0_9, %c0_10], %6 {strides = array<i32>} : memref<1x4x256xf32, #tpu.memory_space<vmem>>, vector<1x4x256xf32>,
    return
  }
  func.func @transform_0(%arg0: i32, %arg1: i32, %arg2: i32) -> (i32, i32, i32) {
    %c0_i32 = arith.constant 0 : i32
    return %arg0, %arg1, %arg2 : i32, i32, i32
  }
  func.func @transform_1(%arg0: i32, %arg1: i32, %arg2: i32) -> (i32, i32, i32) {
    %c0_i32 = arith.constant 0 : i32
    %c0_i32_0 = arith.constant 0 : i32
    %c0_i32_1 = arith.constant 0 : i32
    return %c0_i32, %arg1, %c0_i32_0 : i32, i32, i32
  }
  func.func @transform_2(%arg0: i32, %arg1: i32, %arg2: i32) -> (i32, i32, i32) {
    %c0_i32 = arith.constant 0 : i32
    %c0_i32_0 = arith.constant 0 : i32
    %c0_i32_1 = arith.constant 0 : i32
    return %c0_i32, %arg1, %c0_i32_0 : i32, i32, i32
  }
  func.func @transform_3(%arg0: i32, %arg1: i32, %arg2: i32) -> (i32, i32, i32) {
    %c0_i32 = arith.constant 0 : i32
    return %arg0, %arg1, %arg2 : i32, i32, i32
  }
}

</mosaic_0001>

<bundles_post_ra>
// kernel: tpu_custom_call.1
= control target key start
LH: loop header
LB: loop body
LE: loop exit
PB: predicated region body
PF: predicated region fallthrough
CT: control target
= control target key end

     0   :  { %8 = vsyncpa [#allocation3], 0  ;;  %s824_s0 = inlined_call_operand.hbm [shape: f32[2,4,256], index: 0, kind: input, shape index: {}]   ;;  %s825_s1 = inlined_call_operand.vmem [shape: f32[1,4,1], index: 1, kind: input, shape index: {}]   ;;  %s826_s2 = inlined_call_operand.vmem [shape: f32[1,4,1], index: 2, kind: input, shape index: {}]   ;;  %s827_s3 = inlined_call_operand.hbm [shape: f32[2,4,256], index: 3, kind: output, shape index: {}]  }
   0x1   :  { %10 = vsyncpa [#allocation3 + $0x1], 0 }
   0x2   :  { %11 = vsyncpa [#allocation4], 0 }
   0x3   :  { %13 = vsyncpa [#allocation4 + $0x1], 0  ;;  %s646_s12 = smov 0   ;;  %s648_s13 = smov 0  }
   0x4   :  { %s650_s14 = smov 0   ;;  %s652_s15 = smov 0  }
   0x5   :  { %s654_s16 = smov 0   ;;  %s656_s17 = smov 0  }
   0x6 LB: > { %s424_s18 = sadd.s32 4294967295, %s620_s17   ;;  %s425_s19 = sadd.s32 4294967294, %s620_s17   ;;  %s620_s17 = sphi %s656_s17, %s19_s17   ;;  %s616_s16 = sphi %s654_s16, %s843_s16   ;;  %s612_s15 = sphi %s652_s15, %s842_s15   ;;  %s608_s14 = sphi %s650_s14, %s841_s14   ;;  %s604_s13 = sphi %s648_s13, %s840_s13   ;;  %s600_s12 = sphi %s646_s12, %s839_s12  }
   0x7   : > { %s38_s20 = sadd.s32 1, %s616_s16  ;;  %s49_s21 = sadd.s32 1, %s608_s14 }
   0x8   : > { %p40_p0 = scmp.ge.s32.totalorder %s38_s20, 2  ;;  %p56_p1 = scmp.ne.s32.totalorder %s608_s14, %s604_s13 }
   0x9   : > { %p57_p2 = scmp.eq.s32.totalorder %s620_s17, 0  ;;  %p62_p3 = scmp.ne.s32.totalorder %s604_s13, %s600_s12 }
   0xa   : > { %s845_s20 = smov (%p40_p0, %s38_s20), 0  ;;  %p63_p5 = scmp.eq.s32.totalorder %s424_s18, 0 }
   0xb   : > { %p687_p4 = por %p57_p2, %p56_p1  ;;  %s42_s23 = ssub.s32 %s616_s16, %s845_s20 }
   0xc   : > { %p142_p6 = scmp.eq.s32.totalorder %s424_s18, 1  ;;  %p47_p7 = scmp.eq.s32.totalorder %s42_s23, 0 }
   0xd   : > { %p693_p8 = por %p63_p5, %p62_p3  ;;  %p148_p10 = scmp.eq.s32.totalorder %s425_s19, 1 }
   0xe   : > { %p697_p9 = por %p142_p6, %p56_p1  ;;  %p455_p13 = scmp.lt.s32.totalorder %s620_s17, 2 }
   0xf   : > { %s702_s26 = scalar_select %p47_p7, %s608_s14, %s49_s21  }
  0x10   : > { %s831_s25 = scalar_select %p697_p9, 1, 0 }
  0x11   : > { %p704_p11 = por %p148_p10, %p62_p3  ;;  %s182_s28 = sand.u32 1, %s608_s14  }
  0x12   : > { %s430_s29 = sshll.u32 %s182_s28, 3  ;;  %s441_s30 = sshll.u32 %s616_s16, 7 }
  0x13   : > { %s832_s27 = scalar_select %p704_p11, 1, 0 }
  0x14   : > { %s715_s6 = scalar_lea.hbm %s824_s0, %s441_s30  ;;  %s186_s7 = scalar_lea.vmem [#allocation2], %s430_s29 }
  0x15   : > { %s198_s8 = sshll.u32 %s186_s7, 4  ;;  %p721_p0 = pnand %p455_p13, %p687_p4  ;;  %s717_s8 = int_to_ptr.vmem [resolvable:$true] %s198_s8 }
  0x16   : > { %s183_s10 = scalar_lea.sflag [#allocation3], %s182_s28  ;;  %s508_s11 = scalar_lea.hbm %s715_s6, 128 }
  0x17   : > { %p509_p3 = scmp.ne.s32.totalorder %s715_s6, %s508_s11  ;;  %p510_p5 = pneg %p721_p0 }
  0x18   : > { %s513_s21 = scalar_lea.hbm %s824_s0, 256  ;;  %p514_p4 = scmp.lt.u32.totalorder %s715_s6, %s824_s0 }
  0x19   : > { %p511_p6 = pnand %p510_p5, %p509_p3  ;;  %p515_p10 = scmp.lt.u32.totalorder %s513_s21, %s508_s11 }
  0x1a   : > { %p517_p12 = scmp.lt.u32.totalorder %s508_s11, %s715_s6 }
  0x1b   : > { %p512_p7 = pneg %p511_p6  ;;  %p516_p13 = por %p515_p10, %p514_p4 }
  0x1d   : > { %p518_p1 = por %p517_p12, %p516_p13 }
  0x1f   : > { %p519_p2 = pnand %p518_p1, %p512_p7 }
  0x21   : > { %522 = shalt.err (!%p519_p2)
}
  0x22   : > { %s523_s28 = scalar_lea.vmem %s717_s8, 128  ;;  %s622_s29 = smov [#allocation2]  }
  0x23   : > { %p524_p3 = scmp.ne.s32.totalorder %s717_s8, %s523_s28  ;;  %s528_s30 = sshll.u32 %s622_s29, 4  ;;  %s529_s30 = int_to_ptr.vmem [resolvable:$false] %s528_s30 }
  0x24   : > { %s530_s4 = scalar_lea.vmem %s529_s30, 256  ;;  %p531_p9 = scmp.lt.s32.totalorder %s717_s8, %s529_s30 }
  0x25   : > { %p526_p6 = pnand %p524_p3, %p510_p5  ;;  %p532_p4 = scmp.lt.s32.totalorder %s530_s4, %s523_s28 }
  0x27   : > { %p527_p11 = pneg %p526_p6  ;;  %p533_p10 = por %p532_p4, %p531_p9 }
  0x29   : > { %p534_p12 = pnand %p533_p10, %p527_p11 }
  0x2b   : > { %537 = shalt.err (!%p534_p12)
}
  0x2c   : > { %450 = dma.hbm_to_vmem [thread:$0]  (!%p721_p0), %s715_s6, 128, %s717_s8, %s183_s10  }
  0x2d   : > { %p834_p1 = scmp.lt.s32.totalorder %s620_s17, 3  ;;  %p835_p2 = scmp.ge.s32.totalorder %s620_s17, 1 }
  0x2f   : > { %p204_p5 = pnand %p835_p2, %p834_p1 }
  0x30   : > { %s757_s5 = sand.u32 (!%p204_p5), 1, %s604_s13  }
  0x31   : > { %207 = sbr.rel (%p204_p5) target bundleno = 209 (0xd1), region = 32  ;;  %s434_s7 = sshll.u32 (!%p204_p5), %s757_s5, 3 }
  0x32   : > { %s210_s11 = scalar_lea.sflag (!%p204_p5), [#allocation3], %s757_s5  ;;  %s213_s18 = scalar_lea.vmem (!%p204_p5), [#allocation2], %s434_s7 }
  0x38   : > { %591 = dma.done.wait (%p693_p8), %s210_s11, 128  }
  0x39   : > { %593 = vsyncadd (%p693_p8), %s210_s11, 4294967168  ;;  %v623_v0 = vmov 0   ;;  %v255_v1 = vld [vmem:[%s825_s1] sm:$0xf]  ;;  %v624_v3 = vmov 839922192   ;;  %v263_v5 = vlaneseq }
  0x3a   : > { %507 = vset.pattern.permute.xlu0 %v623_v0  ;;  %v269_v2 = vld [vmem:[%s826_s2] sm:$0xf]  ;;  %v261_v4 = vunpack.c.l.s4 %v624_v3  ;;  %s442_s24 = sshll.u32 %s612_s15, 7  ;;  %s243_s19 = scalar_lea.vmem [#allocation5], %s434_s7 }
  0x3b   : > { %258 = vperm.xlu0 %507, %v255_v1   ;;  %v264_v7 = vshrl.u32 %v263_v5, 7  ;;  %v254_v11 = vld [vmem:[%s213_s18] sm:$0xff]  ;;  %s303_s21 = sshll.u32 %s243_s19, 4  ;;  %s775_s28 = scalar_lea.hbm %s827_s3, %s442_s24  ;;  %s777_s21 = int_to_ptr.vmem [resolvable:$true] %s303_s21 }
  0x3c   : > { %v262_v6 = vunpack.c.0.s8 %v261_v4  ;;  %s285_s29 = scalar_lea.sflag [#allocation4], %s757_s5  ;;  %s538_s30 = scalar_lea.vmem %s777_s21, 128 }
  0x3d   : > { %p539_p8 = scmp.ne.s32.totalorder %s777_s21, %s538_s30  ;;  %p836_p9 = scmp.ne.s32.totalorder %s831_s25, 0 }
  0x3e   : > { %v265_v8 = vsub.s32 %v262_v6, %v264_v7  ;;  %s625_s15 = smov [#allocation5]  }
  0x3f   : > { %272 = vperm.xlu0 %507, %v269_v2   ;;  %p540_p11 = pnand %p539_p8, %p836_p9  ;;  %s542_s4 = sshll.u32 %s625_s15, 4  ;;  %s543_s4 = int_to_ptr.vmem [resolvable:$false] %s542_s4 }
  0x40   : > { %s544_s7 = scalar_lea.vmem %s543_s4, 256  ;;  %p545_p7 = scmp.lt.s32.totalorder %s777_s21, %s543_s4 }
  0x41   : > { %p541_p0 = pneg %p540_p11  ;;  %p546_p13 = scmp.lt.s32.totalorder %s544_s7, %s538_s30 }
  0x43   : > { %p547_p3 = por %p546_p13, %p545_p7 }
  0x45   : > { %p548_p6 = pnand %p547_p3, %p541_p0 }
  0xba   : > { %v259_v9 = vpop.permute.xlu0 %258 }
  0xbb   : > { %v266_v10 = vrot.slane %v259_v9, %v265_v8 }
  0xbd   : > { %v268_v13 = vmul.f32 %v266_v10, %v254_v11 }
  0xbe   : > { %v273_v12 = vpop.permute.xlu0 %272 }
  0xbf   : > { %v280_v14 = vrot.slane %v273_v12, %v265_v8 }
  0xc1   : > { %v282_v15 = vadd.f32 %v280_v14, %v268_v13 }
  0xc3   : > { %283 = vst [vmem:[%s243_s19] sm:$0xff] %v282_v15 }
  0xc4   : > { %551 = shalt.err (!%p548_p6)
}
  0xc5   : > { %s552_s5 = scalar_lea.hbm %s775_s28, 128  ;;  %s556_s6 = scalar_lea.hbm %s827_s3, 256 }
  0xc6   : > { %p553_p4 = scmp.ne.s32.totalorder %s775_s28, %s552_s5  ;;  %p557_p1 = scmp.lt.u32.totalorder %s775_s28, %s827_s3 }
  0xc7   : > { %p558_p2 = scmp.lt.u32.totalorder %s556_s6, %s552_s5  ;;  %p560_p8 = scmp.lt.u32.totalorder %s552_s5, %s775_s28 }
  0xc8   : > { %p554_p10 = pnand %p553_p4, %p836_p9 }
  0xc9   : > { %p559_p5 = por %p558_p2, %p557_p1 }
  0xca   : > { %p555_p12 = pneg %p554_p10 }
  0xcb   : > { %p561_p11 = por %p560_p8, %p559_p5 }
  0xcd   : > { %p562_p0 = pnand %p561_p11, %p555_p12 }
  0xcf   : > { %565 = shalt.err (!%p562_p0)
}
  0xd0   : > { %445 = dma.vmem_to_hbm [thread:$0]  (%p836_p9), %s777_s21, 128, %s775_s28, %s285_s29  }
  0xd1 PF: > { %s315_s10 = sand.u32 1, %s600_s12   ;;  %p837_p7 = scmp.ne.s32.totalorder %s832_s27, 0 }
  0xd2   : > { %p838_p13 = scmp.ge.s32.totalorder %s620_s17, 2  ;;  %s316_s24 = scalar_lea.sflag [#allocation4], %s315_s10 }
  0xd4   : > { %p452_p3 = pnand %p838_p13, %p837_p7 }
  0xd6   : > { %595 = dma.done.wait (!%p452_p3), %s316_s24, 128  }
  0xd7   : > { %597 = vsyncadd (!%p452_p3), %s316_s24, 4294967168  ;;  %s19_s17 = sadd.s32 1, %s620_s17   ;;  %s839_s12 = smov %s604_s13 }
  0xd8   : > { %p16_p6 = scmp.ge.s32.totalorder %s19_s17, 4   ;;  %s840_s13 = smov %s608_s14 }
  0xd9   : > { %s841_s14 = smov %s702_s26  ;;  %s842_s15 = smov %s616_s16 }
  0xda   : > { %s843_s16 = smov %s845_s20  ;;  %18 = sbr.rel (!%p16_p6) target bundleno = 6 (0x6), region = 83 }
  0xe1   :  { %321 = vsyncpa [#allocation3], 1 }
  0xe2   :  { %323 = vsyncpa [#allocation3 + $0x1], 1 }
  0xe3   :  { %324 = vsyncpa [#allocation4], 1 }
  0xe4   :  { %326 = vsyncpa [#allocation4 + $0x1], 1 }

</bundles_post_ra>
